<compile_context>
chip_gen: v5e
topology: v5e:2x2
jax: 0.10.0
libtpu: 0.0.40
codegen_flags: <defaults>
</compile_context>

<pallas_src>
import functools

import jax
import jax.numpy as jnp
import numpy as np
from jax.experimental import pallas as pl
from jax.experimental.pallas import tpu as pltpu


def _round_up(x: int, m: int) -> int:
    return ((x + m - 1) // m) * m


def _usable_vmem_bytes() -> int:
    """Generation-aware VMEM budget: capacity minus headroom for compiler scratch."""
    cap = None
    try:
        info = pltpu.get_tpu_info()
        cap = getattr(info, "vmem_capacity_bytes", None) or getattr(info, "vmem_size_bytes", None)
    except Exception:
        cap = None
    if not cap:
        cap = 64 << 20                       # conservative fallback: fits every generation
    return max(int(cap) - (16 << 20), 32 << 20)


def _fc_kernel(x_ref, w_ref, b_ref, g_ref, be_ref, o_ref, sum_ref, sq_ref, *,
               residual: bool, use_bn: bool, two_phase: bool,
               eps: float, inv_n: float):
    x = x_ref[...]
    # Matmul in the operands' native dtype (bf16 stays bf16), f32 accumulation on MXU.
    y = jnp.dot(x, w_ref[...], preferred_element_type=jnp.float32)

    def _scale_shift(s, ss):
        # Folded BN affine: out = y * scale + shift.  One-pass variance in f32.
        # TODO(synk): E[y^2]-E[y]^2 can lose precision if |mean| >> std; the Linear
        # bias is already dropped under BN, which removes the dominant offset term.
        mean = s * inv_n
        var = jnp.maximum(ss * inv_n - mean * mean, 0.0)
        inv_std = jax.lax.rsqrt(var + eps)
        scale = g_ref[...].astype(jnp.float32) * inv_std
        shift = be_ref[...].astype(jnp.float32) - mean * scale
        return scale, shift

    def _epilogue(out):
        out = jnp.maximum(out, 0.0)                      # ReLU
        if residual:
            out = out + x.astype(jnp.float32)            # k_out == k_in
        o_ref[...] = out.astype(o_ref.dtype)

    if not use_bn:
        _epilogue(y + b_ref[...].astype(jnp.float32))
    elif not two_phase:
        # Single row tile covers the whole batch: local stats == global stats.
        # Linear bias is skipped: BN is shift-invariant per feature, so it cancels.
        s = jnp.sum(y, axis=0, keepdims=True)
        ss = jnp.sum(y * y, axis=0, keepdims=True)
        scale, shift = _scale_shift(s, ss)
        _epilogue(y * scale + shift)
    else:
        phase = pl.program_id(0)
        tile = pl.program_id(1)

        @pl.when(phase == 0)
        def _():
            # Stats pass: accumulate sum(y), sum(y*y).  Zero-padded rows give y == 0
            # exactly (no bias under BN) so no row masking is needed.  o_ref is NOT
            # written: its block index is constant in phase 0, so no HBM writeback
            # happens during this pass.
            @pl.when(tile == 0)
            def _():
                sum_ref[...] = jnp.zeros_like(sum_ref)
                sq_ref[...] = jnp.zeros_like(sq_ref)
            sum_ref[...] += jnp.sum(y, axis=0, keepdims=True)
            sq_ref[...] += jnp.sum(y * y, axis=0, keepdims=True)

        @pl.when(phase == 1)
        def _():
            @pl.when(tile == 0)
            def _():
                scale, shift = _scale_shift(sum_ref[...], sq_ref[...])
                sum_ref[...] = scale         # cache folded affine for the later tiles
                sq_ref[...] = shift
            _epilogue(y * sum_ref[...] + sq_ref[...])


def fc_layer_forward(x, weight, bias, gamma=None, beta=None, *,
                     use_bn=True, eps=1e-5, tile_m_max=None):
    """x: (..., k_in); weight: (k_in, k_out); bias/gamma/beta: (k_out,)."""
    k_in = x.shape[-1]
    k_out = weight.shape[-1]
    residual = (k_in == k_out)

    lead_shape = x.shape[:-1]
    n = int(np.prod(lead_shape)) if lead_shape else 1
    x2d = x.reshape(n, k_in)

    if gamma is None:
        gamma = jnp.ones((k_out,), jnp.float32)
    if beta is None:
        beta = jnp.zeros((k_out,), jnp.float32)

    x_itemsize = jnp.dtype(x.dtype).itemsize
    w_itemsize = jnp.dtype(weight.dtype).itemsize
    sublane = 8 if x_itemsize >= 4 else 16

    usable_vmem = _usable_vmem_bytes()

    # ---- Row tiling only (feature blocks use full dims, no lane padding) ----
    n_sub = _round_up(n, sublane)
    if tile_m_max is None:
        # Size the row tile from the VMEM left after the (double-buffered) resident W.
        resident = 2 * k_in * k_out * w_itemsize + 32 * k_out * 4
        budget = usable_vmem - resident - (4 << 20)
        per_row = 2 * (k_in + k_out) * max(x_itemsize, 4)   # double-buffered x/out rows
        rows = budget // per_row if budget > 0 else sublane
        tile_m_max = int(max(sublane, min(rows, 2048)))
    tile_m = min(_round_up(tile_m_max, sublane), n_sub)
    n_p = _round_up(n, tile_m)
    n_tiles = n_p // tile_m

    x_p = x2d if n_p == n else jnp.pad(x2d, ((0, n_p - n), (0, 0)))
    b_p = bias.reshape(1, k_out)
    g_p = gamma.reshape(1, k_out)
    be_p = beta.reshape(1, k_out)

    two_phase = use_bn and (n_tiles > 1)

    if two_phase:
        grid = (2, n_tiles)
        xmap = lambda p, i: (i, 0)        # x tiles (streamed in both phases)
        cmap = lambda p, i: (0, 0)        # resident weight / params
        omap = lambda p, i: (i * p, 0)    # constant block in phase 0 -> no writeback
        dim_sem = ("arbitrary", "arbitrary")   # stats scratch requires serial tiles
    else:
        grid = (n_tiles,)
        xmap = lambda i: (i, 0)
        cmap = lambda i: (0, 0)
        omap = lambda i: (i, 0)
        dim_sem = ("arbitrary",) if use_bn else ("parallel",)

    kernel = functools.partial(
        _fc_kernel,
        residual=residual, use_bn=use_bn, two_phase=two_phase,
        eps=float(eps), inv_n=1.0 / float(n))

    # VMEM budget: double-buffered x/out tiles + resident W + f32 intermediates + slack.
    vmem_need = (2 * tile_m * k_in * x_itemsize
                 + 2 * tile_m * k_out * x_itemsize
                 + 2 * k_in * k_out * w_itemsize
                 + 4 * tile_m * k_out * 4
                 + 2 * tile_m * k_in * 4
                 + 64 * k_out * 4
                 + (4 << 20))
    vmem_limit = int(min(max(vmem_need, 8 << 20), usable_vmem))

    passes = 2 if two_phase else 1
    cost = pl.CostEstimate(
        flops=int(2 * n_p * k_in * k_out * passes),
        transcendentals=int(k_out if use_bn else 0),
        bytes_accessed=int(passes * n_p * k_in * x_itemsize
                           + k_in * k_out * w_itemsize
                           + n_p * k_out * x_itemsize))

    out2d = pl.pallas_call(
        kernel,
        out_shape=jax.ShapeDtypeStruct((n_p, k_out), x.dtype),
        grid_spec=pltpu.PrefetchScalarGridSpec(
            num_scalar_prefetch=0,
            grid=grid,
            in_specs=[
                pl.BlockSpec((tile_m, k_in), xmap),    # x tiles (streamed)
                pl.BlockSpec((k_in, k_out), cmap),     # W (VMEM-resident)
                pl.BlockSpec((1, k_out), cmap),        # bias (unused under BN)
                pl.BlockSpec((1, k_out), cmap),        # gamma
                pl.BlockSpec((1, k_out), cmap),        # beta
            ],
            out_specs=pl.BlockSpec((tile_m, k_out), omap),
            scratch_shapes=[
                pltpu.VMEM((1, k_out), jnp.float32),   # sum(y)    -> later: BN scale
                pltpu.VMEM((1, k_out), jnp.float32),   # sum(y*y)  -> later: BN shift
            ]),
        compiler_params=pltpu.CompilerParams(
            dimension_semantics=dim_sem,
            vmem_limit_bytes=vmem_limit),
        cost_estimate=cost,
    )(x_p, weight, b_p, g_p, be_p)

    out = out2d if n_p == n else out2d[:n]
    return out.reshape(*lead_shape, k_out)


def _reference(x, weight, bias, gamma=None, beta=None, *, use_bn=True, eps=1e-5):
    lead_shape = x.shape[:-1]
    k_in = x.shape[-1]
    k_out = weight.shape[-1]
    x2d = x.reshape(-1, k_in).astype(jnp.float32)
    y = x2d @ weight.astype(jnp.float32) + bias.astype(jnp.float32)
    if use_bn:
        mean = jnp.mean(y, axis=0, keepdims=True)
        var = jnp.mean((y - mean) ** 2, axis=0, keepdims=True)   # biased (training)
        y = (y - mean) / jnp.sqrt(var + eps)
        y = y * gamma.astype(jnp.float32) + beta.astype(jnp.float32)
    y = jnp.maximum(y, 0.0)
    if k_in == k_out:
        y = y + x2d
    return y.reshape(*lead_shape, k_out).astype(x.dtype)


if __name__ == "__main__":
    key = jax.random.PRNGKey(0)

    def make_params(k, k_in, k_out):
        kw, kb = jax.random.split(k)
        bound = 1.0 / np.sqrt(k_in)
        w = jax.random.uniform(kw, (k_in, k_out), jnp.float32, -bound, bound)
        b = jax.random.uniform(kb, (k_out,), jnp.float32, -bound, bound)
        return w, b

    k1, k2, k3, k4, k5 = jax.random.split(key, 5)

    # Case 1: toy module shape (B=2, S=8, k=32), residual + BN, single fused tile.
    x1 = jax.random.normal(k1, (2, 8, 32), dtype=jnp.float32)
    w1, b1 = make_params(k2, 32, 32)
    g1 = jnp.ones((32,), jnp.float32)
    be1 = jnp.zeros((32,), jnp.float32)
    out1 = jax.block_until_ready(fc_layer_forward(x1, w1, b1, g1, be1, use_bn=True))
    ref1 = _reference(x1, w1, b1, g1, be1, use_bn=True)
    np.testing.assert_allclose(np.asarray(out1), np.asarray(ref1), rtol=1e-3, atol=1e-3)

    # Case 2: larger batch (N=1200 rows), residual + BN.  Auto-derived tile_m makes
    # this a single fused tile (single-pass BN, no padding, no two-phase recompute).
    x2 = jax.random.normal(k3, (3, 400, 48), dtype=jnp.float32)
    w2, b2 = make_params(k4, 48, 48)
    g2 = jax.random.normal(k5, (48,), dtype=jnp.float32) * 0.1 + 1.0
    be2 = jax.random.normal(k1, (48,), dtype=jnp.float32) * 0.1
    out2 = jax.block_until_ready(fc_layer_forward(x2, w2, b2, g2, be2, use_bn=True))
    ref2 = _reference(x2, w2, b2, g2, be2, use_bn=True)
    np.testing.assert_allclose(np.asarray(out2), np.asarray(ref2), rtol=1e-3, atol=1e-3)

    # Case 2b: same data with a forced small row tile to exercise the two-phase
    # tiled-BN path (5 row tiles + 80 zero-padded rows, no phase-0 writeback).
    out2b = jax.block_until_ready(
        fc_layer_forward(x2, w2, b2, g2, be2, use_bn=True, tile_m_max=256))
    np.testing.assert_allclose(np.asarray(out2b), np.asarray(ref2), rtol=1e-3, atol=1e-3)

    # Case 3: k_in != k_out (no residual), no BN.
    x3 = jax.random.normal(k2, (2, 8, 32), dtype=jnp.float32)
    w3, b3 = make_params(k3, 32, 64)
    out3 = jax.block_until_ready(fc_layer_forward(x3, w3, b3, use_bn=False))
    ref3 = _reference(x3, w3, b3, use_bn=False)
    np.testing.assert_allclose(np.asarray(out3), np.asarray(ref3), rtol=1e-3, atol=1e-3)

    print("KERNEL_OK")
</pallas_src>

<mosaic_0001>
module attributes {stable_mosaic.version = 11 : i64} {
  func.func @_fc_kernel(%arg0: i32, %arg1: memref<16x32xf32, #tpu.memory_space<vmem>>, %arg2: memref<32x32xf32, #tpu.memory_space<vmem>>, %arg3: memref<1x32xf32, #tpu.memory_space<vmem>>, %arg4: memref<1x32xf32, #tpu.memory_space<vmem>>, %arg5: memref<1x32xf32, #tpu.memory_space<vmem>>, %arg6: memref<16x32xf32, #tpu.memory_space<vmem>>, %arg7: memref<1x32xf32, #tpu.memory_space<vmem>>, %arg8: memref<1x32xf32, #tpu.memory_space<vmem>>) attributes {dimension_semantics = [#tpu.dimension_semantics<arbitrary>], iteration_bounds = array<i64: 1>, scalar_prefetch = 0 : i64, scratch_operands = 2 : i64, tpu.core_type = #tpu.core_type<tc>, window_params = [{transform_indices = @transform_0, window_bounds = array<i64: 16, 32>}, {pipeline_mode = #tpu.pipeline_mode<synchronous>, transform_indices = @transform_1, window_bounds = array<i64: 32, 32>}, {pipeline_mode = #tpu.pipeline_mode<synchronous>, transform_indices = @transform_2, window_bounds = array<i64: 1, 32>}, {pipeline_mode = #tpu.pipeline_mode<synchronous>, transform_indices = @transform_3, window_bounds = array<i64: 1, 32>}, {pipeline_mode = #tpu.pipeline_mode<synchronous>, transform_indices = @transform_4, window_bounds = array<i64: 1, 32>}, {transform_indices = @transform_5, window_bounds = array<i64: 16, 32>}]} {
    %c0 = arith.constant 0 : index
    %c0_0 = arith.constant 0 : index
    %0 = vector.load %arg1[%c0, %c0_0] : memref<16x32xf32, #tpu.memory_space<vmem>>, vector<16x32xf32>
    %c0_1 = arith.constant 0 : index
    %c0_2 = arith.constant 0 : index
    %1 = vector.load %arg2[%c0_1, %c0_2] : memref<32x32xf32, #tpu.memory_space<vmem>>, vector<32x32xf32>
    %cst = arith.constant dense<0.000000e+00> : vector<16x32xf32>
    %2 = tpu.matmul %0, %1, %cst {dimension_numbers = #tpu.dot_dimension_numbers<[1], [0], [0], [1], [0, 0, 1, 1], [], []>} : vector<16x32xf32>, vector<32x32xf32>, vector<16x32xf32> -> vector<16x32xf32>
    %cst_3 = arith.constant dense<0.000000e+00> : vector<32xf32>
    %3 = vector.multi_reduction <add>, %2, %cst_3 [0] : vector<16x32xf32> to vector<32xf32>
    %4 = vector.shape_cast %3 : vector<32xf32> to vector<1x32xf32>
    %5 = arith.mulf %2, %2 : vector<16x32xf32>
    %cst_4 = arith.constant dense<0.000000e+00> : vector<32xf32>
    %6 = vector.multi_reduction <add>, %5, %cst_4 [0] : vector<16x32xf32> to vector<32xf32>
    %7 = vector.shape_cast %6 : vector<32xf32> to vector<1x32xf32>
    %cst_5 = arith.constant 6.250000e-02 : f32
    %8 = vector.broadcast %cst_5 : f32 to vector<1x32xf32>
    %9 = arith.mulf %4, %8 : vector<1x32xf32>
    %cst_6 = arith.constant 6.250000e-02 : f32
    %10 = vector.broadcast %cst_6 : f32 to vector<1x32xf32>
    %11 = arith.mulf %7, %10 : vector<1x32xf32>
    %12 = arith.mulf %9, %9 : vector<1x32xf32>
    %13 = arith.subf %11, %12 : vector<1x32xf32>
    %cst_7 = arith.constant 0.000000e+00 : f32
    %14 = vector.broadcast %cst_7 : f32 to vector<1x32xf32>
    %15 = arith.maximumf %13, %14 : vector<1x32xf32>
    %cst_8 = arith.constant 9.99999974E-6 : f32
    %16 = vector.broadcast %cst_8 : f32 to vector<1x32xf32>
    %17 = arith.addf %15, %16 : vector<1x32xf32>
    %18 = math.rsqrt %17 : vector<1x32xf32>
    %c0_9 = arith.constant 0 : index
    %c0_10 = arith.constant 0 : index
    %19 = vector.load %arg4[%c0_9, %c0_10] : memref<1x32xf32, #tpu.memory_space<vmem>>, vector<1x32xf32>
    %20 = arith.mulf %19, %18 : vector<1x32xf32>
    %c0_11 = arith.constant 0 : index
    %c0_12 = arith.constant 0 : index
    %21 = vector.load %arg5[%c0_11, %c0_12] : memref<1x32xf32, #tpu.memory_space<vmem>>, vector<1x32xf32>
    %22 = arith.mulf %9, %20 : vector<1x32xf32>
    %23 = arith.subf %21, %22 : vector<1x32xf32>
    %24 = vector.broadcast %20 : vector<1x32xf32> to vector<16x32xf32>
    %25 = arith.mulf %2, %24 : vector<16x32xf32>
    %26 = vector.broadcast %23 : vector<1x32xf32> to vector<16x32xf32>
    %27 = arith.addf %25, %26 : vector<16x32xf32>
    %cst_13 = arith.constant 0.000000e+00 : f32
    %28 = vector.broadcast %cst_13 : f32 to vector<16x32xf32>
    %29 = arith.maximumf %27, %28 : vector<16x32xf32>
    %30 = arith.addf %29, %0 : vector<16x32xf32>
    %c0_14 = arith.constant 0 : index
    %c0_15 = arith.constant 0 : index
    %31 = vector.load %arg6[%c0_14, %c0_15] : memref<16x32xf32, #tpu.memory_space<vmem>>, vector<16x32xf32>
    tpu.vector_store %arg6[%c0_14, %c0_15], %30 {strides = array<i32>} : memref<16x32xf32, #tpu.memory_space<vmem>>, vector<16x32xf32>,
    return
  }
  func.func @transform_0(%arg0: i32) -> (i32, i32) {
    %c0_i32 = arith.constant 0 : i32
    %c0_i32_0 = arith.constant 0 : i32
    return %arg0, %c0_i32 : i32, i32
  }
  func.func @transform_1(%arg0: i32) -> (i32, i32) {
    %c0_i32 = arith.constant 0 : i32
    %c0_i32_0 = arith.constant 0 : i32
    %c0_i32_1 = arith.constant 0 : i32
    return %c0_i32, %c0_i32_0 : i32, i32
  }
  func.func @transform_2(%arg0: i32) -> (i32, i32) {
    %c0_i32 = arith.constant 0 : i32
    %c0_i32_0 = arith.constant 0 : i32
    %c0_i32_1 = arith.constant 0 : i32
    return %c0_i32, %c0_i32_0 : i32, i32
  }
  func.func @transform_3(%arg0: i32) -> (i32, i32) {
    %c0_i32 = arith.constant 0 : i32
    %c0_i32_0 = arith.constant 0 : i32
    %c0_i32_1 = arith.constant 0 : i32
    return %c0_i32, %c0_i32_0 : i32, i32
  }
  func.func @transform_4(%arg0: i32) -> (i32, i32) {
    %c0_i32 = arith.constant 0 : i32
    %c0_i32_0 = arith.constant 0 : i32
    %c0_i32_1 = arith.constant 0 : i32
    return %c0_i32, %c0_i32_0 : i32, i32
  }
  func.func @transform_5(%arg0: i32) -> (i32, i32) {
    %c0_i32 = arith.constant 0 : i32
    %c0_i32_0 = arith.constant 0 : i32
    return %arg0, %c0_i32 : i32, i32
  }
}

</mosaic_0001>

<bundles_post_ra>
// kernel: tpu_custom_call.1
= control target key start
LH: loop header
LB: loop body
LE: loop exit
PB: predicated region body
PF: predicated region fallthrough
CT: control target
= control target key end

     0   :  { %10 = vsyncpa [#allocation5], 0  ;;  %s328_s0 = inlined_call_operand.hbm [shape: f32[16,32], index: 0, kind: input, shape index: {}]   ;;  %s329_s1 = inlined_call_operand.hbm [shape: f32[32,32], index: 1, kind: input, shape index: {}]   ;;  %s330_s2 = inlined_call_operand.vmem [shape: f32[1,32], index: 2, kind: input, shape index: {}]   ;;  %s331_s3 = inlined_call_operand.vmem [shape: f32[1,32], index: 3, kind: input, shape index: {}]   ;;  %s332_s4 = inlined_call_operand.vmem [shape: f32[1,32], index: 4, kind: input, shape index: {}]   ;;  %s333_s5 = inlined_call_operand.hbm [shape: f32[16,32], index: 5, kind: output, shape index: {}]  }
   0x1   :  { %11 = vsyncpa [#allocation8], 0 }
   0x2   :  { %12 = vsyncpa [#allocation6], 0  ;;  %s17_s20 = sshll.u32 %s328_s0, 4  ;;  %s257_s21 = smov [#allocation4]   ;;  %s18_s20 = int_to_ptr.hbm [resolvable:$true] %s17_s20 }
   0x3   :  { %s19_s22 = sshll.u32 %s257_s21, 4  ;;  %s30_s24 = sshll.u32 %s329_s1, 4  ;;  %s20_s22 = int_to_ptr.vmem [resolvable:$true] %s19_s22  ;;  %s31_s24 = int_to_ptr.hbm [resolvable:$true] %s30_s24 }
   0x4   :  { %s258_s25 = smov 128   ;;  %s259_s26 = smov 8  }
   0x5   :  { %25 = dma.hbm_to_vmem [thread:$0]  %s18_s20, 256, %s20_s22, [#allocation5], %s258_s25, %s258_s25, %s259_s26  }
   0x6   :  { %s260_s27 = smov [#allocation7]  }
   0x7   :  { %s32_s28 = sshll.u32 %s260_s27, 4  ;;  %s33_s28 = int_to_ptr.vmem [resolvable:$true] %s32_s28 }
   0x8   :  { %38 = dma.hbm_to_vmem [thread:$0]  %s31_s24, 512, %s33_s28, [#allocation8], %s258_s25, %s258_s25, %s259_s26  }
   0x9   :  { %251 = dma.done.wait [#allocation5], 256  }
   0xa   :  { %252 = vsyncadd [#allocation5], 4294967040 }
   0xb   :  { %253 = dma.done.wait [#allocation8], 512  }
   0xc   :  { %254 = vsyncadd [#allocation8], 4294966784  ;;  %v58_v0 = vld [vmem:[#allocation7 + $0x18] sm:$0xff]  ;;  %v57_v1 = vld [vmem:[#allocation7 + $0x10] sm:$0xff]  ;;  %vm59_vm0 = vcmask 261120   ;;  %s261_s6 = smov [#allocation9]  }
   0xd   :  { %78 = vmatpush.msra.mxu0 %v58_v0  ;;  %168 = vmatpush.msra.mxu1 %v58_v0  ;;  %v56_v2 = vld [vmem:[#allocation7 + $0x8] sm:$0xff]  ;;  %v55_v3 = vld [vmem:[#allocation7] sm:$0xff]  ;;  %v304_v4 = vld [vmem:[#allocation4] sm:$0xff]  ;;  %s150_s7 = sshll.u32 %s261_s6, 4  ;;  %s152_s9 = sshll.u32 %s333_s5, 4  ;;  %s151_s7 = int_to_ptr.vmem [resolvable:$true] %s150_s7  ;;  %s153_s9 = int_to_ptr.hbm [resolvable:$true] %s152_s9 }
   0xe   :  { %v54_v5 = vld [vmem:[#allocation4 + $0x8] sm:$0xff]  ;;  %v125_v40 = vld [vmem:[%s331_s3] sm:$0x1] }
   0xf   :  { %79 = vmatpush.msra.mxu0 %v57_v1  ;;  %169 = vmatpush.msra.mxu1 %v57_v1  ;;  %v127_v43 = vld [vmem:[%s332_s4] sm:$0x1] }
  0x11   :  { %80 = vmatpush.msra.mxu0 %v56_v2  ;;  %170 = vmatpush.msra.mxu1 %v56_v2 }
  0x13   :  { %81 = vmatpush.msra.mxu0 %v55_v3  ;;  %171 = vmatpush.msra.mxu1 %v55_v3 }
  0x14   :  { %166 = vmatmul.msk.f32.vlgmr.msra.gmra.mxu0 %vm59_vm0, %v304_v4  ;;  %167 = vmatmul.msk.f32.vlgmr.msra.gmra.mxu1 %vm59_vm0, %v54_v5 }
  0x91   :  { %v83_v6 = vpop.f32.mrf.mxu0  ;;  %v86_v7 = vpop.f32.mrf.mxu1 }
  0x92   :  { %v89_v8 = vsel %vm59_vm0, %v83_v6, 0.0  ;;  %v98_v9 = vmul.f32 %v83_v6, %v83_v6  ;;  %v90_v10 = vsel %vm59_vm0, %v86_v7, 0.0  ;;  %v99_v11 = vmul.f32 %v86_v7, %v86_v7 }
  0x93   :  { %v91_v12 = vadd.f32 %v90_v10, %v89_v8 }
  0x94   :  { %v100_v13 = vsel %vm59_vm0, %v98_v9, 0.0  ;;  %v101_v14 = vsel %vm59_vm0, %v99_v11, 0.0 }
  0x95   :  { %v92_v15 = vrot.slane %v91_v12, 4  ;;  %v102_v16 = vadd.f32 %v101_v14, %v100_v13 }
  0x97   :  { %v93_v17 = vadd.f32 %v92_v15, %v91_v12  ;;  %v103_v18 = vrot.slane %v102_v16, 4 }
  0x99   :  { %v94_v19 = vrot.slane %v93_v17, 2  ;;  %v104_v20 = vadd.f32 %v103_v18, %v102_v16 }
  0x9b   :  { %v95_v21 = vadd.f32 %v94_v19, %v93_v17  ;;  %v105_v22 = vrot.slane %v104_v20, 2 }
  0x9d   :  { %v96_v23 = vrot.slane %v95_v21, 1  ;;  %v106_v24 = vadd.f32 %v105_v22, %v104_v20 }
  0x9f   :  { %v97_v25 = vadd.f32 %v96_v23, %v95_v21  ;;  %v107_v26 = vrot.slane %v106_v24, 1 }
  0xa1   :  { %v108_v27 = vadd.f32 %v107_v26, %v106_v24  ;;  %v109_v28 = vmul.f32 0.0625, %v97_v25 }
  0xa3   :  { %v110_v29 = vmul.f32 0.0625, %v108_v27  ;;  %v111_v30 = vmul.f32 %v109_v28, %v109_v28 }
  0xa5   :  { %v112_v31 = vsub.f32 %v110_v29, %v111_v30 }
  0xa7   :  { %v113_v32 = vmax.f32 %v112_v31, 0.0 }
  0xa9   :  { %v114_v33 = vadd.f32 1e-05, %v113_v32 }
  0xab   :  { %177 = vrsqrt.f32 %v114_v33  ;;  %vm121_vm2 = vweird.f32 %v114_v33 }
  0xb1   :  { %v178_v34 = vpop.eup %177 }
  0xb2   :  { %v116_v35 = vmul.f32 %v178_v34, %v114_v33  ;;  %vm122_vm1 = vweird.f32 %v178_v34 }
  0xb3   :  { %vm123_vm3 = vmor %vm121_vm2, %vm122_vm1 }
  0xb4   :  { %v117_v36 = vmul.f32 %v178_v34, %v116_v35 }
  0xb6   :  { %v118_v37 = vmul.f32 0.5, %v117_v36 }
  0xb8   :  { %v119_v38 = vsub.f32 1.5, %v118_v37 }
  0xba   :  { %v120_v39 = vmul.f32 %v178_v34, %v119_v38 }
  0xbc   :  { %v124_v41 = vsel %vm123_vm3, %v178_v34, %v120_v39 }
  0xbd   :  { %v126_v42 = vmul.f32 %v125_v40, %v124_v41 }
  0xbf   :  { %v128_v44 = vmul.f32 %v126_v42, %v109_v28  ;;  %v131_v45 = vperm.slane %v126_v42, 0 }
  0xc1   :  { %v129_v46 = vsub.f32 %v127_v43, %v128_v44  ;;  %v133_v47 = vmul.f32 %v131_v45, %v83_v6  ;;  %v134_v48 = vmul.f32 %v131_v45, %v86_v7 }
  0xc3   :  { %v136_v49 = vperm.slane %v129_v46, 0 }
  0xc5   :  { %v138_v50 = vadd.f32 %v136_v49, %v133_v47  ;;  %v139_v51 = vadd.f32 %v136_v49, %v134_v48 }
  0xc7   :  { %v140_v52 = vmax.f32 %v138_v50, 0.0  ;;  %v141_v53 = vmax.f32 %v139_v51, 0.0 }
  0xc9   :  { %v143_v54 = vadd.f32 %v141_v53, %v54_v5  ;;  %v142_v55 = vadd.f32 %v140_v52, %v304_v4 }
  0xcb   :  { %145 = vst.msk [vmem:[#allocation9 + $0x8] sm:$0xff] %vm59_vm0, %v143_v54 }
  0xcc   :  { %144 = vst.msk [vmem:[#allocation9] sm:$0xff] %vm59_vm0, %v142_v55 }
  0xcd   :  { %158 = dma.vmem_to_hbm [thread:$0]  %s151_s7, 256, %s153_s9, [#allocation6], %s258_s25, %s258_s25, %s259_s26  }
  0xce   :  { %255 = dma.done.wait [#allocation6], 256  }
  0xcf   :  { %256 = vsyncadd [#allocation6], 4294967040 }
  0xd0   :  { %163 = vsyncpa [#allocation5], 1 }
  0xd1   :  { %164 = vsyncpa [#allocation8], 1 }
  0xd2   :  { %165 = vsyncpa [#allocation6], 1 }

</bundles_post_ra>
